<compile_context>
chip_gen: v7x
topology: tpu7x:2x2x1
jax: 0.10.0
libtpu: 0.0.40
codegen_flags: <defaults>
</compile_context>

<pallas_src>
import jax
import jax.numpy as jnp
from jax.experimental import pallas as pl
from jax.experimental.pallas import tpu as pltpu

# ---------------- model dims (small, consistent with forward) ----------------
B = 2              # batch
CIN = 4            # input channels
H = W = 16         # spatial
CF = 16            # backbone feature channels (gram size CF x CF)
KH = KW = 3        # conv kernel
HIDDEN = 32        # MLP hidden
NUM_CLASSES = 7    # emotions
HW = H * W         # 256
FEAT = 2 * CF      # pca feat concat pooled feat

# ---------------- fused-conv / packing layout constants -----------------------
WPAD = W + 2                 # 18 : padded width  (1 left + 1 right)
HPAD = H + 3                 # 19 : padded height (1 top + 2 bottom; extra row keeps
                             #      the largest shifted window in bounds)
SPAD = HPAD * WPAD           # 342: flattened padded image per (b, ci)
N_SP = H * WPAD              # 288: conv output width (stride-18 rows, cols j>=16 masked)
BCIN = B * CIN               # 8  : rows of the flattened input
BCF = B * CF                 # 32 : rows of the transposed feature map
NCP = 8                      # classes padded to 8 per batch block

WIDE_ROWS = 40               # conv taps (32 rows) + mask row + pad to multiple of 8
R_MASK = BCF                 # row 32 of the wide block holds the valid-column mask
NARROW_LANES = B * HIDDEN    # 64
R_VEXP, R_W1, R_W2 = 0, 32, 96
R_CB, R_B1, R_B2 = 112, 144, 208
NARROW_ROWS = 224


# ------------------------------ Pallas kernel ---------------------------------
def _emotion_gram_kernel(x_ref, wide_ref, nar_ref, out_ref):
    """Whole forward pass in one invocation; everything stays in VMEM."""
    # --- BaseNet conv: 9 shifted-tap block-diagonal matmuls, F transposed ------
    # x_ref is the padded image flattened with row stride WPAD=18, so tap (di,dj)
    # is a contiguous lane window starting at di*18+dj.
    f = None
    for t in range(KH * KW):
        di, dj = t // KW, t % KW
        off = di * WPAD + dj
        w_t = wide_ref[0:BCF, t * BCIN:(t + 1) * BCIN]           # (32, 8) block-diag tap
        x_t = x_ref[:, off:off + N_SP]                           # (8, 288) shifted window
        c = jnp.dot(w_t, x_t, preferred_element_type=jnp.float32)
        f = c if f is None else f + c                            # (32, 288)
    cb = nar_ref[R_CB:R_CB + BCF, 0:1]                           # conv bias column (32, 1)
    f = jnp.maximum(f + cb, 0.0)
    fm = f * wide_ref[R_MASK:R_MASK + 1, :]                      # zero the j>=16 garbage cols

    # --- PCA projection + pooled feature, (b, c)-in-sublanes column layout -----
    vexp = nar_ref[R_VEXP:R_VEXP + BCF, 0:BCF]                   # (32, 32) block-diag v/HW
    u = jnp.dot(vexp, fm, preferred_element_type=jnp.float32)    # u[(b,c),n] = (F_b v)[n]/HW
    pcol = jnp.sum(fm * u, axis=1, keepdims=True)                # (32,1) == (F F^T/HW) v
    ycol = jnp.sum(fm, axis=1, keepdims=True)                    # (32,1) == HW*GAP (1/HW in W1)
    gcol = jnp.concatenate([pcol, ycol], axis=0)                 # (64,1) == feat, column form

    # --- MLP head: block-diagonal weights, one matmul per layer ----------------
    # TODO(synk): gramnet.MLP dropout layers are identity in eval mode; omitted.
    w1bd = nar_ref[R_W1:R_W1 + B * HIDDEN, :]                    # (64, 64)
    b1c = nar_ref[R_B1:R_B1 + B * HIDDEN, 0:1]                   # (64, 1)
    h = jnp.maximum(jnp.dot(w1bd, gcol, preferred_element_type=jnp.float32) + b1c, 0.0)
    w2bd = nar_ref[R_W2:R_W2 + B * NCP, :]                       # (16, 64)
    b2c = nar_ref[R_B2:R_B2 + B * NCP, 0:1]                      # (16, 1)
    out_ref[...] = jnp.dot(w2bd, h, preferred_element_type=jnp.float32) + b2c


# ----------------------- one-time constant preparation ------------------------
def _block_diag(m, n):
    r, c = m.shape
    out = jnp.zeros((n * r, n * c), m.dtype)
    for i in range(n):
        out = out.at[i * r:(i + 1) * r, i * c:(i + 1) * c].set(m)
    return out


def prepare_params(params):
    """Pack all constant weights into two VMEM-friendly blocks (called once)."""
    conv_w, conv_b, pca_v, w1, b1, w2, b2 = [p.astype(jnp.float32) for p in params]

    # WIDE (40, 288): rows 0..31 = 9 block-diag conv taps side by side,
    #                 row 32    = valid-column mask (j < 16 of each stride-18 row).
    taps = [_block_diag(conv_w[:, :, di, dj], B) for di in range(KH) for dj in range(KW)]
    tap_block = jnp.concatenate(taps, axis=1)                                 # (32, 72)
    tap_block = jnp.pad(tap_block, ((0, 0), (0, N_SP - KH * KW * BCIN)))      # (32, 288)
    mask = ((jnp.arange(N_SP) % WPAD) < W).astype(jnp.float32)[None, :]       # (1, 288)
    wide = jnp.concatenate(
        [tap_block, mask, jnp.zeros((WIDE_ROWS - BCF - 1, N_SP), jnp.float32)], axis=0)

    # NARROW (224, 64): block-diag PCA projector / W1 / W2 plus bias columns.
    vexp = _block_diag(jnp.tile((pca_v / HW)[None, :], (CF, 1)), B)           # (32, 32)
    w1bd = jnp.concatenate([_block_diag(w1[:CF, :].T, B),
                            _block_diag(w1[CF:, :].T / HW, B)], axis=1)       # (64, 64)
    w2pad = jnp.pad(w2.T, ((0, NCP - NUM_CLASSES), (0, 0)))                   # (8, 32)
    w2bd = _block_diag(w2pad, B)                                              # (16, 64)
    cb_col = jnp.tile(conv_b, B)[:, None]                                     # (32, 1)
    b1_col = jnp.tile(b1, B)[:, None]                                         # (64, 1)
    b2_col = jnp.tile(jnp.pad(b2, (0, NCP - NUM_CLASSES)), B)[:, None]        # (16, 1)

    def lane_pad(a):
        return jnp.pad(a, ((0, 0), (0, NARROW_LANES - a.shape[1])))

    narrow = jnp.concatenate(
        [lane_pad(vexp), w1bd, w2bd, lane_pad(cb_col), lane_pad(b1_col), lane_pad(b2_col)],
        axis=0)                                                               # (224, 64)
    return wide, narrow


# ------------------------------ forward wrapper --------------------------------
@jax.jit
def emotion_gram_forward(x, prepared):
    """x: (B, CIN, H, W) float32, NCHW. Returns logits (B, NUM_CLASSES)."""
    wide, narrow = prepared
    # Only remaining XLA glue: SAME-conv zero padding of the 8 KiB input
    # (row-stride-18 flattening is a free reshape, no transpose, no im2col).
    xp = jnp.pad(x.astype(jnp.float32),
                 ((0, 0), (0, 0), (1, HPAD - H - 1), (1, WPAD - W - 1)))
    xp = xp.reshape(BCIN, SPAD)

    full = lambda shape: pl.BlockSpec(shape, lambda i: (0, 0))
    out = pl.pallas_call(
        _emotion_gram_kernel,
        out_shape=jax.ShapeDtypeStruct((B * NCP, 1), jnp.float32),
        grid=(1,),
        in_specs=[
            full((BCIN, SPAD)),              # padded, flattened input (8, 342)
            full((WIDE_ROWS, N_SP)),         # conv taps + column mask (40, 288)
            full((NARROW_ROWS, NARROW_LANES)),  # PCA/MLP weights + bias cols (224, 64)
        ],
        out_specs=full((B * NCP, 1)),
        compiler_params=pltpu.CompilerParams(dimension_semantics=("arbitrary",)),
    )(xp, wide, narrow)
    return out.reshape(B, NCP)[:, :NUM_CLASSES]


# --------------------------- pure-JAX reference --------------------------------
def reference_forward(x, params):
    conv_w, conv_b, pca_v, w1, b1, w2, b2 = params
    f = jax.lax.conv_general_dilated(
        x, conv_w, window_strides=(1, 1), padding="SAME",
        dimension_numbers=("NCHW", "OIHW", "NCHW"),
        precision=jax.lax.Precision.HIGHEST)
    f = jax.nn.relu(f + conv_b.reshape(1, CF, 1, 1))             # (B, CF, H, W)
    y = f.mean(axis=(2, 3))                                      # (B, CF)
    f2 = f.reshape(B, CF, HW)
    g = jnp.einsum("bch,bdh->bcd", f2, f2,
                   precision=jax.lax.Precision.HIGHEST) / HW     # (B, CF, CF)
    pca = jnp.einsum("bcd,d->bc", g, pca_v,
                     precision=jax.lax.Precision.HIGHEST)        # (B, CF)
    feat = jnp.concatenate([pca, y], axis=1)                     # (B, 2CF)
    h = jax.nn.relu(feat @ w1 + b1)
    return h @ w2 + b2


# ------------------------------ param init -------------------------------------
def init_params(key):
    ks = jax.random.split(key, 5)
    conv_w = jax.random.normal(ks[0], (CF, CIN, KH, KW), jnp.float32) * 0.1
    conv_b = jnp.linspace(-0.05, 0.05, CF, dtype=jnp.float32)
    pca_v = jax.random.normal(ks[1], (CF,), jnp.float32) * 0.2
    w1 = jax.random.normal(ks[2], (FEAT, HIDDEN), jnp.float32) * 0.1
    b1 = jnp.zeros((HIDDEN,), jnp.float32)
    w2 = jax.random.normal(ks[3], (HIDDEN, NUM_CLASSES), jnp.float32) * 0.1
    b2 = jnp.zeros((NUM_CLASSES,), jnp.float32)
    return (conv_w, conv_b, pca_v, w1, b1, w2, b2)


if __name__ == "__main__":
    key = jax.random.PRNGKey(0)
    kx, kp = jax.random.split(key)
    x = jax.random.normal(kx, (B, CIN, H, W), jnp.float32)
    params = init_params(kp)
    prepared = prepare_params(params)        # one-time constant packing (hoisted)

    out = emotion_gram_forward(x, prepared)
    jax.block_until_ready(out)
    assert out.shape == (B, NUM_CLASSES), out.shape

    ref = reference_forward(x, params)
    if not jnp.allclose(out, ref, rtol=5e-3, atol=5e-3):
        raise AssertionError("Pallas kernel disagrees with JAX reference")

    print("KERNEL_OK")
</pallas_src>

<mosaic_0001>
module attributes {stable_mosaic.version = 11 : i64} {
  func.func @_emotion_gram_kernel(%arg0: i32, %arg1: memref<8x342xf32, #tpu.memory_space<vmem>>, %arg2: memref<40x288xf32, #tpu.memory_space<vmem>>, %arg3: memref<224x64xf32, #tpu.memory_space<vmem>>, %arg4: memref<16x1xf32, #tpu.memory_space<vmem>>) attributes {dimension_semantics = [#tpu.dimension_semantics<arbitrary>], iteration_bounds = array<i64: 1>, scalar_prefetch = 0 : i64, scratch_operands = 0 : i64, tpu.core_type = #tpu.core_type<tc>, window_params = [{pipeline_mode = #tpu.pipeline_mode<synchronous>, transform_indices = @transform_0, window_bounds = array<i64: 8, 342>}, {pipeline_mode = #tpu.pipeline_mode<synchronous>, transform_indices = @transform_1, window_bounds = array<i64: 40, 288>}, {pipeline_mode = #tpu.pipeline_mode<synchronous>, transform_indices = @transform_2, window_bounds = array<i64: 224, 64>}, {pipeline_mode = #tpu.pipeline_mode<synchronous>, transform_indices = @transform_3, window_bounds = array<i64: 16, 1>}]} {
    %c0 = arith.constant 0 : index
    %c0_0 = arith.constant 0 : index
    %0 = vector.load %arg2[%c0, %c0_0] : memref<40x288xf32, #tpu.memory_space<vmem>>, vector<32x8xf32>
    %c0_1 = arith.constant 0 : index
    %c0_2 = arith.constant 0 : index
    %1 = vector.load %arg1[%c0_1, %c0_2] : memref<8x342xf32, #tpu.memory_space<vmem>>, vector<8x288xf32>
    %cst = arith.constant dense<0.000000e+00> : vector<32x288xf32>
    %2 = tpu.matmul %0, %1, %cst {dimension_numbers = #tpu.dot_dimension_numbers<[1], [0], [0], [1], [0, 0, 1, 1], [], []>} : vector<32x8xf32>, vector<8x288xf32>, vector<32x288xf32> -> vector<32x288xf32>
    %c0_3 = arith.constant 0 : index
    %c8 = arith.constant 8 : index
    %3 = vector.load %arg2[%c0_3, %c8] : memref<40x288xf32, #tpu.memory_space<vmem>>, vector<32x8xf32>
    %c0_4 = arith.constant 0 : index
    %c1 = arith.constant 1 : index
    %4 = vector.load %arg1[%c0_4, %c1] : memref<8x342xf32, #tpu.memory_space<vmem>>, vector<8x288xf32>
    %cst_5 = arith.constant dense<0.000000e+00> : vector<32x288xf32>
    %5 = tpu.matmul %3, %4, %cst_5 {dimension_numbers = #tpu.dot_dimension_numbers<[1], [0], [0], [1], [0, 0, 1, 1], [], []>} : vector<32x8xf32>, vector<8x288xf32>, vector<32x288xf32> -> vector<32x288xf32>
    %6 = arith.addf %2, %5 : vector<32x288xf32>
    %c0_6 = arith.constant 0 : index
    %c16 = arith.constant 16 : index
    %7 = vector.load %arg2[%c0_6, %c16] : memref<40x288xf32, #tpu.memory_space<vmem>>, vector<32x8xf32>
    %c0_7 = arith.constant 0 : index
    %c2 = arith.constant 2 : index
    %8 = vector.load %arg1[%c0_7, %c2] : memref<8x342xf32, #tpu.memory_space<vmem>>, vector<8x288xf32>
    %cst_8 = arith.constant dense<0.000000e+00> : vector<32x288xf32>
    %9 = tpu.matmul %7, %8, %cst_8 {dimension_numbers = #tpu.dot_dimension_numbers<[1], [0], [0], [1], [0, 0, 1, 1], [], []>} : vector<32x8xf32>, vector<8x288xf32>, vector<32x288xf32> -> vector<32x288xf32>
    %10 = arith.addf %6, %9 : vector<32x288xf32>
    %c0_9 = arith.constant 0 : index
    %c24 = arith.constant 24 : index
    %11 = vector.load %arg2[%c0_9, %c24] : memref<40x288xf32, #tpu.memory_space<vmem>>, vector<32x8xf32>
    %c0_10 = arith.constant 0 : index
    %c18 = arith.constant 18 : index
    %12 = vector.load %arg1[%c0_10, %c18] : memref<8x342xf32, #tpu.memory_space<vmem>>, vector<8x288xf32>
    %cst_11 = arith.constant dense<0.000000e+00> : vector<32x288xf32>
    %13 = tpu.matmul %11, %12, %cst_11 {dimension_numbers = #tpu.dot_dimension_numbers<[1], [0], [0], [1], [0, 0, 1, 1], [], []>} : vector<32x8xf32>, vector<8x288xf32>, vector<32x288xf32> -> vector<32x288xf32>
    %14 = arith.addf %10, %13 : vector<32x288xf32>
    %c0_12 = arith.constant 0 : index
    %c32 = arith.constant 32 : index
    %15 = vector.load %arg2[%c0_12, %c32] : memref<40x288xf32, #tpu.memory_space<vmem>>, vector<32x8xf32>
    %c0_13 = arith.constant 0 : index
    %c19 = arith.constant 19 : index
    %16 = vector.load %arg1[%c0_13, %c19] : memref<8x342xf32, #tpu.memory_space<vmem>>, vector<8x288xf32>
    %cst_14 = arith.constant dense<0.000000e+00> : vector<32x288xf32>
    %17 = tpu.matmul %15, %16, %cst_14 {dimension_numbers = #tpu.dot_dimension_numbers<[1], [0], [0], [1], [0, 0, 1, 1], [], []>} : vector<32x8xf32>, vector<8x288xf32>, vector<32x288xf32> -> vector<32x288xf32>
    %18 = arith.addf %14, %17 : vector<32x288xf32>
    %c0_15 = arith.constant 0 : index
    %c40 = arith.constant 40 : index
    %19 = vector.load %arg2[%c0_15, %c40] : memref<40x288xf32, #tpu.memory_space<vmem>>, vector<32x8xf32>
    %c0_16 = arith.constant 0 : index
    %c20 = arith.constant 20 : index
    %20 = vector.load %arg1[%c0_16, %c20] : memref<8x342xf32, #tpu.memory_space<vmem>>, vector<8x288xf32>
    %cst_17 = arith.constant dense<0.000000e+00> : vector<32x288xf32>
    %21 = tpu.matmul %19, %20, %cst_17 {dimension_numbers = #tpu.dot_dimension_numbers<[1], [0], [0], [1], [0, 0, 1, 1], [], []>} : vector<32x8xf32>, vector<8x288xf32>, vector<32x288xf32> -> vector<32x288xf32>
    %22 = arith.addf %18, %21 : vector<32x288xf32>
    %c0_18 = arith.constant 0 : index
    %c48 = arith.constant 48 : index
    %23 = vector.load %arg2[%c0_18, %c48] : memref<40x288xf32, #tpu.memory_space<vmem>>, vector<32x8xf32>
    %c0_19 = arith.constant 0 : index
    %c36 = arith.constant 36 : index
    %24 = vector.load %arg1[%c0_19, %c36] : memref<8x342xf32, #tpu.memory_space<vmem>>, vector<8x288xf32>
    %cst_20 = arith.constant dense<0.000000e+00> : vector<32x288xf32>
    %25 = tpu.matmul %23, %24, %cst_20 {dimension_numbers = #tpu.dot_dimension_numbers<[1], [0], [0], [1], [0, 0, 1, 1], [], []>} : vector<32x8xf32>, vector<8x288xf32>, vector<32x288xf32> -> vector<32x288xf32>
    %26 = arith.addf %22, %25 : vector<32x288xf32>
    %c0_21 = arith.constant 0 : index
    %c56 = arith.constant 56 : index
    %27 = vector.load %arg2[%c0_21, %c56] : memref<40x288xf32, #tpu.memory_space<vmem>>, vector<32x8xf32>
    %c0_22 = arith.constant 0 : index
    %c37 = arith.constant 37 : index
    %28 = vector.load %arg1[%c0_22, %c37] : memref<8x342xf32, #tpu.memory_space<vmem>>, vector<8x288xf32>
    %cst_23 = arith.constant dense<0.000000e+00> : vector<32x288xf32>
    %29 = tpu.matmul %27, %28, %cst_23 {dimension_numbers = #tpu.dot_dimension_numbers<[1], [0], [0], [1], [0, 0, 1, 1], [], []>} : vector<32x8xf32>, vector<8x288xf32>, vector<32x288xf32> -> vector<32x288xf32>
    %30 = arith.addf %26, %29 : vector<32x288xf32>
    %c0_24 = arith.constant 0 : index
    %c64 = arith.constant 64 : index
    %31 = vector.load %arg2[%c0_24, %c64] : memref<40x288xf32, #tpu.memory_space<vmem>>, vector<32x8xf32>
    %c0_25 = arith.constant 0 : index
    %c38 = arith.constant 38 : index
    %32 = vector.load %arg1[%c0_25, %c38] : memref<8x342xf32, #tpu.memory_space<vmem>>, vector<8x288xf32>
    %cst_26 = arith.constant dense<0.000000e+00> : vector<32x288xf32>
    %33 = tpu.matmul %31, %32, %cst_26 {dimension_numbers = #tpu.dot_dimension_numbers<[1], [0], [0], [1], [0, 0, 1, 1], [], []>} : vector<32x8xf32>, vector<8x288xf32>, vector<32x288xf32> -> vector<32x288xf32>
    %34 = arith.addf %30, %33 : vector<32x288xf32>
    %c112 = arith.constant 112 : index
    %c0_27 = arith.constant 0 : index
    %35 = vector.load %arg3[%c112, %c0_27] : memref<224x64xf32, #tpu.memory_space<vmem>>, vector<32x1xf32>
    %36 = vector.broadcast %35 : vector<32x1xf32> to vector<32x288xf32>
    %37 = arith.addf %34, %36 : vector<32x288xf32>
    %cst_28 = arith.constant 0.000000e+00 : f32
    %38 = vector.broadcast %cst_28 : f32 to vector<32x288xf32>
    %39 = arith.maximumf %37, %38 : vector<32x288xf32>
    %c32_29 = arith.constant 32 : index
    %c0_30 = arith.constant 0 : index
    %40 = vector.load %arg2[%c32_29, %c0_30] : memref<40x288xf32, #tpu.memory_space<vmem>>, vector<1x288xf32>
    %41 = vector.broadcast %40 : vector<1x288xf32> to vector<32x288xf32>
    %42 = arith.mulf %39, %41 : vector<32x288xf32>
    %c0_31 = arith.constant 0 : index
    %c0_32 = arith.constant 0 : index
    %43 = vector.load %arg3[%c0_31, %c0_32] : memref<224x64xf32, #tpu.memory_space<vmem>>, vector<32x32xf32>
    %cst_33 = arith.constant dense<0.000000e+00> : vector<32x288xf32>
    %44 = tpu.matmul %43, %42, %cst_33 {dimension_numbers = #tpu.dot_dimension_numbers<[1], [0], [0], [1], [0, 0, 1, 1], [], []>} : vector<32x32xf32>, vector<32x288xf32>, vector<32x288xf32> -> vector<32x288xf32>
    %45 = arith.mulf %42, %44 : vector<32x288xf32>
    %cst_34 = arith.constant dense<0.000000e+00> : vector<32xf32>
    %46 = vector.multi_reduction <add>, %45, %cst_34 [1] : vector<32x288xf32> to vector<32xf32>
    %47 = vector.shape_cast %46 : vector<32xf32> to vector<32x1xf32>
    %cst_35 = arith.constant dense<0.000000e+00> : vector<32xf32>
    %48 = vector.multi_reduction <add>, %42, %cst_35 [1] : vector<32x288xf32> to vector<32xf32>
    %49 = vector.shape_cast %48 : vector<32xf32> to vector<32x1xf32>
    %50 = tpu.concatenate %47, %49 in 0 : vector<32x1xf32>, vector<32x1xf32> -> vector<64x1xf32>
    %c32_36 = arith.constant 32 : index
    %c0_37 = arith.constant 0 : index
    %51 = vector.load %arg3[%c32_36, %c0_37] : memref<224x64xf32, #tpu.memory_space<vmem>>, vector<64x64xf32>
    %c144 = arith.constant 144 : index
    %c0_38 = arith.constant 0 : index
    %52 = vector.load %arg3[%c144, %c0_38] : memref<224x64xf32, #tpu.memory_space<vmem>>, vector<64x1xf32>
    %cst_39 = arith.constant dense<0.000000e+00> : vector<64x1xf32>
    %53 = tpu.matmul %51, %50, %cst_39 {dimension_numbers = #tpu.dot_dimension_numbers<[1], [0], [0], [1], [0, 0, 1, 1], [], []>} : vector<64x64xf32>, vector<64x1xf32>, vector<64x1xf32> -> vector<64x1xf32>
    %54 = arith.addf %53, %52 : vector<64x1xf32>
    %cst_40 = arith.constant 0.000000e+00 : f32
    %55 = vector.broadcast %cst_40 : f32 to vector<64x1xf32>
    %56 = arith.maximumf %54, %55 : vector<64x1xf32>
    %c96 = arith.constant 96 : index
    %c0_41 = arith.constant 0 : index
    %57 = vector.load %arg3[%c96, %c0_41] : memref<224x64xf32, #tpu.memory_space<vmem>>, vector<16x64xf32>
    %c208 = arith.constant 208 : index
    %c0_42 = arith.constant 0 : index
    %58 = vector.load %arg3[%c208, %c0_42] : memref<224x64xf32, #tpu.memory_space<vmem>>, vector<16x1xf32>
    %cst_43 = arith.constant dense<0.000000e+00> : vector<16x1xf32>
    %59 = tpu.matmul %57, %56, %cst_43 {dimension_numbers = #tpu.dot_dimension_numbers<[1], [0], [0], [1], [0, 0, 1, 1], [], []>} : vector<16x64xf32>, vector<64x1xf32>, vector<16x1xf32> -> vector<16x1xf32>
    %60 = arith.addf %59, %58 : vector<16x1xf32>
    %c0_44 = arith.constant 0 : index
    %c0_45 = arith.constant 0 : index
    %61 = vector.load %arg4[%c0_44, %c0_45] : memref<16x1xf32, #tpu.memory_space<vmem>>, vector<16x1xf32>
    tpu.vector_store %arg4[%c0_44, %c0_45], %60 {strides = array<i32>} : memref<16x1xf32, #tpu.memory_space<vmem>>, vector<16x1xf32>,
    return
  }
  func.func @transform_0(%arg0: i32) -> (i32, i32) {
    %c0_i32 = arith.constant 0 : i32
    %c0_i32_0 = arith.constant 0 : i32
    %c0_i32_1 = arith.constant 0 : i32
    return %c0_i32, %c0_i32_0 : i32, i32
  }
  func.func @transform_1(%arg0: i32) -> (i32, i32) {
    %c0_i32 = arith.constant 0 : i32
    %c0_i32_0 = arith.constant 0 : i32
    %c0_i32_1 = arith.constant 0 : i32
    return %c0_i32, %c0_i32_0 : i32, i32
  }
  func.func @transform_2(%arg0: i32) -> (i32, i32) {
    %c0_i32 = arith.constant 0 : i32
    %c0_i32_0 = arith.constant 0 : i32
    %c0_i32_1 = arith.constant 0 : i32
    return %c0_i32, %c0_i32_0 : i32, i32
  }
  func.func @transform_3(%arg0: i32) -> (i32, i32) {
    %c0_i32 = arith.constant 0 : i32
    %c0_i32_0 = arith.constant 0 : i32
    %c0_i32_1 = arith.constant 0 : i32
    return %c0_i32, %c0_i32_0 : i32, i32
  }
}

</mosaic_0001>

<bundles_post_ra>
// kernel: emotion_gram_forward.1
= control target key start
LH: loop header
LB: loop body
LE: loop exit
PB: predicated region body
PF: predicated region fallthrough
CT: control target
= control target key end

     0   :  { %v2947_v2 = vmov 0.0   ;;  %s2948_s16 = smov 127   ;;  %s2949_s21 = smov 120   ;;  %vm42_vm0 = vcmask 1039360   ;;  %vm48_vm1 = vcmask 64512   ;;  %vm427_vm2 = vcmask 1031168   ;;  %s3505_s0 = inlined_call_operand.vmem [shape: f32[8,342], index: 0, kind: input, shape index: {}]   ;;  %s3506_s1 = inlined_call_operand.vmem [shape: f32[40,288], index: 1, kind: input, shape index: {}]   ;;  %s3507_s2 = inlined_call_operand.vmem [shape: f32[224,64], index: 2, kind: input, shape index: {}]   ;;  %s3508_s3 = inlined_call_operand.vmem [shape: f32[16,1], index: 3, kind: output, shape index: {}]  }
   0x1   :  { %v2988_v0 = vld [vmem:[%s3505_s0 + $0x8] sm:$0xff]  ;;  %v2993_v1 = vld [vmem:[%s3505_s0] sm:$0xff]  ;;  %121 = vmatprep.mubr.f32.mxu0 %v2947_v2  ;;  %127 = vmatprep.mubr.f32.mxu1 %v2947_v2  ;;  %v3002_v3 = vld [vmem:[%s3505_s0 + $0x10] sm:$0xff]  ;;  %s2950_s22 = smov 126   ;;  %s2951_s0 = smov 112   ;;  %v2964_v19 = vmov 0  }
   0x2   :  { %38 = vrot.lane.b32.xlu0 %v2988_v0, %s2948_s16  ;;  %36 = vrot.lane.b32.xlu1 %v2993_v1, %s2948_s16  ;;  %v3007_v4 = vld [vmem:[%s3506_s1] sm:$0xff]  ;;  %v3019_v5 = vld [vmem:[%s3506_s1 + $0x18] sm:$0xff]  ;;  %s2952_s29 = smov 110   ;;  %s2953_s30 = smov 104   ;;  %vm641_vm3 = vcmask 900096   ;;  %vm855_vm4 = vcmask 891904  }
   0x3   :  { %v3024_v6 = vld [vmem:[%s3506_s1 + $0x30] sm:$0xff]  ;;  %v3031_v7 = vld [vmem:[%s3506_s1 + $0x48] sm:$0xff]  ;;  %s2954_s4 = smov 109   ;;  %s2955_s5 = smov 96   ;;  %2945 = vset.pattern.permute.xlu0 %v2964_v19  ;;  %2946 = vset.pattern.permute.xlu1 %v2964_v19  ;;  %v1912_v21 = vld [vmem:[%s3507_s2 + $0x78] sm:$0xff]  ;;  %vm1069_vm5 = vcmask 883712  }
   0x4   :  { %s2956_s6 = smov 108   ;;  %s2957_s7 = smov 88   ;;  %v1911_v20 = vld [vmem:[%s3507_s2 + $0x70] sm:$0xff]  ;;  %v1914_v23 = vld [vmem:[%s3507_s2 + $0x88] sm:$0xff]  ;;  %v1913_v24 = vld [vmem:[%s3507_s2 + $0x80] sm:$0xff]  ;;  %vm1283_vm6 = vcmask 752640  }
   0x5   :  { %s2958_s8 = smov 92   ;;  %s2959_s9 = smov 80   ;;  %vm1497_vm7 = vcmask 744448   ;;  %vm1711_vm8 = vcmask 736256   ;;  %vm1993_vm9 = vcmask 261120   ;;  %vm2248_vm10 = vcmask 523264  }
   0x6   :  { %40 = vrot.lane.b32.xlu0 %v3002_v3, %s2948_s16  ;;  %25 = vrot.lane.b32.xlu1 %v3007_v4, %s2949_s21  ;;  %s2960_s10 = smov 91   ;;  %s2961_s11 = smov 72   ;;  %vm2471_vm11 = vcmask 7168  }
   0x7   :  { %s2962_s12 = smov 90   ;;  %s2963_s13 = smov 64  }
   0xa   :  { %423 = vrot.lane.b32.xlu0 %v2988_v0, %s2950_s22  ;;  %425 = vrot.lane.b32.xlu1 %v3002_v3, %s2950_s22 }
   0xe   :  { %421 = vrot.lane.b32.xlu0 %v2993_v1, %s2950_s22  ;;  %413 = vrot.lane.b32.xlu1 %v3007_v4, %s2951_s0 }
  0x12   :  { %415 = vrot.lane.b32.xlu0 %v3019_v5, %s2951_s0  ;;  %417 = vrot.lane.b32.xlu1 %v3024_v6, %s2951_s0 }
  0x16   :  { %419 = vrot.lane.b32.xlu0 %v3031_v7, %s2951_s0  ;;  %637 = vrot.lane.b32.xlu1 %v2988_v0, %s2952_s29 }
  0x1a   :  { %639 = vrot.lane.b32.xlu0 %v3002_v3, %s2952_s29  ;;  %635 = vrot.lane.b32.xlu1 %v2993_v1, %s2952_s29 }
  0x1e   :  { %627 = vrot.lane.b32.xlu0 %v3007_v4, %s2953_s30  ;;  %629 = vrot.lane.b32.xlu1 %v3019_v5, %s2953_s30 }
  0x22   :  { %631 = vrot.lane.b32.xlu0 %v3024_v6, %s2953_s30  ;;  %633 = vrot.lane.b32.xlu1 %v3031_v7, %s2953_s30 }
  0x26   :  { %851 = vrot.lane.b32.xlu0 %v2988_v0, %s2954_s4  ;;  %853 = vrot.lane.b32.xlu1 %v3002_v3, %s2954_s4 }
  0x2a   :  { %849 = vrot.lane.b32.xlu0 %v2993_v1, %s2954_s4  ;;  %841 = vrot.lane.b32.xlu1 %v3007_v4, %s2955_s5 }
  0x2e   :  { %843 = vrot.lane.b32.xlu0 %v3019_v5, %s2955_s5  ;;  %845 = vrot.lane.b32.xlu1 %v3024_v6, %s2955_s5 }
  0x32   :  { %847 = vrot.lane.b32.xlu0 %v3031_v7, %s2955_s5  ;;  %1065 = vrot.lane.b32.xlu1 %v2988_v0, %s2956_s6 }
  0x36   :  { %1067 = vrot.lane.b32.xlu0 %v3002_v3, %s2956_s6  ;;  %27 = vrot.lane.b32.xlu1 %v3019_v5, %s2949_s21 }
  0x3a   :  { %1063 = vrot.lane.b32.xlu0 %v2993_v1, %s2956_s6  ;;  %1055 = vrot.lane.b32.xlu1 %v3007_v4, %s2957_s7 }
  0x3e   :  { %29 = vrot.lane.b32.xlu0 %v3024_v6, %s2949_s21  ;;  %1057 = vrot.lane.b32.xlu1 %v3019_v5, %s2957_s7 }
  0x42   :  { %31 = vrot.lane.b32.xlu0 %v3031_v7, %s2949_s21  ;;  %1059 = vrot.lane.b32.xlu1 %v3024_v6, %s2957_s7 }
  0x46   :  { %1061 = vrot.lane.b32.xlu0 %v3031_v7, %s2957_s7  ;;  %1279 = vrot.lane.b32.xlu1 %v2988_v0, %s2958_s8 }
  0x4a   :  { %1281 = vrot.lane.b32.xlu0 %v3002_v3, %s2958_s8  ;;  %1277 = vrot.lane.b32.xlu1 %v2993_v1, %s2958_s8 }
  0x4e   :  { %1269 = vrot.lane.b32.xlu0 %v3007_v4, %s2959_s9  ;;  %1271 = vrot.lane.b32.xlu1 %v3019_v5, %s2959_s9 }
  0x52   :  { %1273 = vrot.lane.b32.xlu0 %v3024_v6, %s2959_s9  ;;  %1275 = vrot.lane.b32.xlu1 %v3031_v7, %s2959_s9 }
  0x56   :  { %1493 = vrot.lane.b32.xlu0 %v2988_v0, %s2960_s10  ;;  %1495 = vrot.lane.b32.xlu1 %v3002_v3, %s2960_s10 }
  0x5a   :  { %1491 = vrot.lane.b32.xlu0 %v2993_v1, %s2960_s10  ;;  %1483 = vrot.lane.b32.xlu1 %v3007_v4, %s2961_s11 }
  0x5e   :  { %1485 = vrot.lane.b32.xlu0 %v3019_v5, %s2961_s11  ;;  %1487 = vrot.lane.b32.xlu1 %v3024_v6, %s2961_s11 }
  0x62   :  { %1489 = vrot.lane.b32.xlu0 %v3031_v7, %s2961_s11  ;;  %1707 = vrot.lane.b32.xlu1 %v2988_v0, %s2962_s12 }
  0x66   :  { %1709 = vrot.lane.b32.xlu0 %v3002_v3, %s2962_s12  ;;  %1705 = vrot.lane.b32.xlu1 %v2993_v1, %s2962_s12 }
  0x6a   :  { %1697 = vrot.lane.b32.xlu0 %v3007_v4, %s2963_s13  ;;  %1699 = vrot.lane.b32.xlu1 %v3019_v5, %s2963_s13 }
  0x6e   :  { %1701 = vrot.lane.b32.xlu0 %v3024_v6, %s2963_s13  ;;  %1703 = vrot.lane.b32.xlu1 %v3031_v7, %s2963_s13 }
  0x72   :  { %1917 = vperm.xlu0 %2945, %v1911_v20   ;;  %1922 = vperm.xlu1 %2946, %v1912_v21  }
  0x74   :  { %v39_v8 = vpop.permute.xlu0 %38  ;;  %v37_v9 = vpop.permute.xlu1 %36 }
  0x75   :  { %v43_v13 = vsel %vm42_vm0, %v37_v9, %v39_v8 }
  0x76   :  { %1932 = vperm.xlu0 %2945, %v1914_v23   ;;  %1927 = vperm.xlu1 %2946, %v1913_v24  }
  0x78   :  { %v3082_v10 = vpop.permute.xlu0 %40  ;;  %v3084_v11 = vpop.permute.xlu1 %25 }
  0x79   :  { %v44_v12 = vsel %vm42_vm0, %v39_v8, %v3082_v10 }
  0x7a   :  { %57 = vmatprep.subr.mxu0 %v44_v12  ;;  %2829 = vmatprep.subr.mxu1 %v44_v12 }
  0x7b   :  { %58 = vmatpush1.msra.mxu0 %v43_v13  ;;  %2830 = vmatpush1.msra.mxu1 %v43_v13 }
  0x7c   :  { %v424_v14 = vpop.permute.xlu0 %423  ;;  %2478 = vmatmul.mubr.msk.f32.vlgmr.msra.gmra.mrb[0].mxu0 %vm48_vm1, %v3084_v11  ;;  %2648 = vmatprep.subr.mxu1 %v3082_v10  ;;  %v3090_v15 = vpop.permute.xlu1 %425 }
  0x7d   :  { %239 = vmatprep.subr.mxu0 %v2988_v0  ;;  %v429_v16 = vsel %vm427_vm2, %v424_v14, %v3090_v15  ;;  %303 = vmatprep.mubr.f32.mxu0 %v2947_v2 }
  0x7e   :  { %240 = vmatpush1.msra.mxu0 %v2993_v1 }
  0x7f   :  { %441 = vmatprep.subr.mxu0 %v429_v16 }
  0x80   :  { %v422_v17 = vpop.permute.xlu0 %421  ;;  %v3097_v18 = vpop.permute.xlu1 %413 }
  0x81   :  { %v428_v22 = vsel %vm427_vm2, %v422_v17, %v424_v14 }
  0x84   :  { %v3112_v25 = vpop.permute.xlu0 %415  ;;  %2486 = vmatmul.mubr.msk.f32.vlgmr.msra.gmra.mrb[0].mxu0 %vm48_vm1, %v3007_v4  ;;  %v3116_v26 = vpop.permute.xlu1 %417 }
  0x85   :  { %442 = vmatpush1.msra.mxu0 %v428_v22  ;;  %309 = vmatprep.mubr.f32.mxu0 %v2947_v2 }
  0x88   :  { %v3119_v27 = vpop.permute.xlu0 %419  ;;  %2487 = vmatmul.mubr.msk.f32.gmra.mrb[2].mxu0 %vm48_vm1, %v3019_v5  ;;  %v638_v28 = vpop.permute.xlu1 %637 }
  0x89   :  { %315 = vmatprep.mubr.f32.mxu0 %v2947_v2 }
  0x8c   :  { %v3124_v29 = vpop.permute.xlu0 %639  ;;  %2488 = vmatmul.mubr.msk.f32.gmra.mrb[4].mxu0 %vm48_vm1, %v3024_v6  ;;  %v636_v30 = vpop.permute.xlu1 %635 }
  0x8d   :  { %321 = vmatprep.mubr.f32.mxu0 %v2947_v2  ;;  %v643_v31 = vsel %vm641_vm3, %v638_v28, %v3124_v29  ;;  %v642_v34 = vsel %vm641_vm3, %v636_v30, %v638_v28  ;;  %v1962_v28 = vlaneseq }
  0x8e   :  { %655 = vmatprep.subr.mxu0 %v643_v31 }
  0x8f   :  { %v1963_v30 = vshrl.u32 %v1962_v28, 7 }
  0x90   :  { %v3130_v32 = vpop.permute.xlu0 %627  ;;  %2489 = vmatmul.mubr.msk.f32.gmra.mrb[6].mxu0 %vm48_vm1, %v3031_v7  ;;  %v3134_v33 = vpop.permute.xlu1 %629 }
  0x91   :  { %505 = vmatprep.mubr.f32.mxu0 %v2947_v2 }
  0x94   :  { %v3137_v35 = vpop.permute.xlu0 %631  ;;  %2494 = vmatmul.mubr.msk.f32.vlgmr.msra.gmra.mrb[0].mxu0 %vm48_vm1, %v3097_v18  ;;  %v3141_v36 = vpop.permute.xlu1 %633 }
  0x95   :  { %656 = vmatpush1.msra.mxu0 %v642_v34  ;;  %511 = vmatprep.mubr.f32.mxu0 %v2947_v2 }
  0x98   :  { %v852_v37 = vpop.permute.xlu0 %851  ;;  %2495 = vmatmul.mubr.msk.f32.gmra.mrb[2].mxu0 %vm48_vm1, %v3112_v25  ;;  %v3146_v38 = vpop.permute.xlu1 %853 }
  0x99   :  { %517 = vmatprep.mubr.f32.mxu0 %v2947_v2  ;;  %v857_v39 = vsel %vm855_vm4, %v852_v37, %v3146_v38 }
  0x9a   :  { %869 = vmatprep.subr.mxu0 %v857_v39  ;;  %v1964_v39 = vsub.s32 0, %v1963_v30 }
  0x9c   :  { %v850_v40 = vpop.permute.xlu0 %849  ;;  %2496 = vmatmul.mubr.msk.f32.gmra.mrb[4].mxu0 %vm48_vm1, %v3116_v26  ;;  %v3152_v41 = vpop.permute.xlu1 %841 }
  0x9d   :  { %523 = vmatprep.mubr.f32.mxu0 %v2947_v2  ;;  %v856_v44 = vsel %vm855_vm4, %v850_v40, %v852_v37 }
  0xa0   :  { %v3155_v42 = vpop.permute.xlu0 %843  ;;  %2497 = vmatmul.mubr.msk.f32.gmra.mrb[6].mxu0 %vm48_vm1, %v3119_v27  ;;  %v3159_v43 = vpop.permute.xlu1 %845 }
  0xa1   :  { %719 = vmatprep.mubr.f32.mxu0 %v2947_v2 }
  0xa4   :  { %v3162_v45 = vpop.permute.xlu0 %847  ;;  %2502 = vmatmul.mubr.msk.f32.vlgmr.msra.gmra.mrb[0].mxu0 %vm48_vm1, %v3130_v32  ;;  %v1066_v46 = vpop.permute.xlu1 %1065 }
  0xa5   :  { %870 = vmatpush1.msra.mxu0 %v856_v44  ;;  %725 = vmatprep.mubr.f32.mxu0 %v2947_v2 }
  0xa8   :  { %v3167_v47 = vpop.permute.xlu0 %1067  ;;  %2503 = vmatmul.mubr.msk.f32.gmra.mrb[2].mxu0 %vm48_vm1, %v3134_v33  ;;  %v28_v48 = vpop.permute.xlu1 %27 }
  0xa9   :  { %2479 = vmatmul.mubr.msk.f32.vlgmr.msra.gmra.mrb[0].mxu1 %vm48_vm1, %v28_v48  ;;  %731 = vmatprep.mubr.f32.mxu0 %v2947_v2  ;;  %v1071_v49 = vsel %vm1069_vm5, %v1066_v46, %v3167_v47 }
  0xaa   :  { %2649 = vmatpush3.msra.mxu1 %v3082_v10  ;;  %1083 = vmatprep.subr.mxu0 %v1071_v49 }
  0xab   :  { %133 = vmatprep.mubr.f32.mxu1 %v2947_v2  ;;  %2656 = vmatprep.subr.mxu1 %v3002_v3 }
  0xac   :  { %v1064_v50 = vpop.permute.xlu0 %1063  ;;  %2504 = vmatmul.mubr.msk.f32.gmra.mrb[4].mxu0 %vm48_vm1, %v3137_v35  ;;  %v3180_v51 = vpop.permute.xlu1 %1055 }
  0xad   :  { %737 = vmatprep.mubr.f32.mxu0 %v2947_v2  ;;  %v1070_v54 = vsel %vm1069_vm5, %v1064_v50, %v1066_v46 }
  0xb0   :  { %v30_v52 = vpop.permute.xlu0 %29  ;;  %2505 = vmatmul.mubr.msk.f32.gmra.mrb[6].mxu0 %vm48_vm1, %v3141_v36  ;;  %v3185_v53 = vpop.permute.xlu1 %1057 }
  0xb1   :  { %2480 = vmatmul.mubr.msk.f32.gmra.mrb[2].mxu1 %vm48_vm1, %v30_v52  ;;  %933 = vmatprep.mubr.f32.mxu0 %v2947_v2 }
  0xb2   :  { %139 = vmatprep.mubr.f32.mxu1 %v2947_v2 }
  0xb4   :  { %v32_v55 = vpop.permute.xlu0 %31  ;;  %2510 = vmatmul.mubr.msk.f32.vlgmr.msra.gmra.mrb[0].mxu0 %vm48_vm1, %v3152_v41  ;;  %v3193_v56 = vpop.permute.xlu1 %1059 }
  0xb5   :  { %1084 = vmatpush1.msra.mxu0 %v1070_v54  ;;  %2481 = vmatmul.mubr.msk.f32.gmra.mrb[4].mxu1 %vm48_vm1, %v32_v55 }
  0xb6   :  { %2650 = vmatprep.mubr.msk.f32.mxu1 %vm48_vm1, %v3084_v11  ;;  %939 = vmatprep.mubr.f32.mxu0 %v2947_v2 }
  0xb8   :  { %2511 = vmatmul.mubr.msk.f32.gmra.mrb[2].mxu0 %vm48_vm1, %v3155_v42  ;;  %v3201_v57 = vpop.permute.xlu0 %1061  ;;  %v1280_v58 = vpop.permute.xlu1 %1279 }
  0xb9   :  { %2651 = vmatmul.mubr.msk.f32.vlgmr.msra.gmra.mrb[6].mxu1 %vm48_vm1, %v28_v48  ;;  %945 = vmatprep.mubr.f32.mxu0 %v2947_v2 }
  0xba   :  { %2657 = vmatpush3.msra.mxu1 %v3002_v3  ;;  %2653 = vmatprep.mubr.msk.f32.mxu1 %vm48_vm1, %v30_v52 }
  0xbb   :  { %2664 = vmatprep.subr.mxu1 %v3090_v15 }
  0xbc   :  { %2512 = vmatmul.mubr.msk.f32.gmra.mrb[4].mxu0 %vm48_vm1, %v3159_v43  ;;  %v3210_v59 = vpop.permute.xlu0 %1281  ;;  %v1278_v60 = vpop.permute.xlu1 %1277 }
  0xbd   :  { %2654 = vmatmul.mubr.msk.f32.gmra.mrb[8].mxu1 %vm48_vm1, %v32_v55  ;;  %951 = vmatprep.mubr.f32.mxu0 %v2947_v2  ;;  %v1285_v61 = vsel %vm1283_vm6, %v1280_v58, %v3210_v59  ;;  %v1284_v0 = vsel %vm1283_vm6, %v1278_v60, %v1280_v58 }
  0xbe   :  { %2658 = vmatprep.mubr.msk.f32.mxu1 %vm48_vm1, %v3007_v4  ;;  %1297 = vmatprep.subr.mxu0 %v1285_v61 }
  0xc0   :  { %2513 = vmatmul.mubr.msk.f32.gmra.mrb[6].mxu0 %vm48_vm1, %v3162_v45  ;;  %v3219_v62 = vpop.permute.xlu0 %1269  ;;  %v3221_v63 = vpop.permute.xlu1 %1271 }
  0xc1   :  { %2659 = vmatmul.mubr.msk.f32.vlgmr.msra.gmra.mrb[6].mxu1 %vm48_vm1, %v3019_v5  ;;  %1147 = vmatprep.mubr.f32.mxu0 %v2947_v2 }
  0xc2   :  { %2665 = vmatpush3.msra.mxu1 %v3090_v15  ;;  %2661 = vmatprep.mubr.msk.f32.mxu1 %vm48_vm1, %v3024_v6 }
  0xc3   :  { %2672 = vmatprep.subr.mxu1 %v3124_v29 }
  0xc4   :  { %2518 = vmatmul.mubr.msk.f32.vlgmr.msra.gmra.mrb[0].mxu0 %vm48_vm1, %v3180_v51  ;;  %v3232_v1 = vpop.permute.xlu0 %1273  ;;  %v3234_v3 = vpop.permute.xlu1 %1275 }
  0xc5   :  { %1298 = vmatpush1.msra.mxu0 %v1284_v0  ;;  %2662 = vmatmul.mubr.msk.f32.gmra.mrb[8].mxu1 %vm48_vm1, %v3031_v7 }
  0xc6   :  { %2666 = vmatprep.mubr.msk.f32.mxu1 %vm48_vm1, %v3097_v18  ;;  %1153 = vmatprep.mubr.f32.mxu0 %v2947_v2 }
  0xc8   :  { %2519 = vmatmul.mubr.msk.f32.gmra.mrb[2].mxu0 %vm48_vm1, %v3185_v53  ;;  %v1494_v4 = vpop.permute.xlu0 %1493  ;;  %v1496_v5 = vpop.permute.xlu1 %1495 }
  0xc9   :  { %2667 = vmatmul.mubr.msk.f32.vlgmr.msra.gmra.mrb[6].mxu1 %vm48_vm1, %v3112_v25  ;;  %1159 = vmatprep.mubr.f32.mxu0 %v2947_v2  ;;  %v1499_v6 = vsel %vm1497_vm7, %v1494_v4, %v1496_v5 }
  0xca   :  { %2673 = vmatpush3.msra.mxu1 %v3124_v29  ;;  %2669 = vmatprep.mubr.msk.f32.mxu1 %vm48_vm1, %v3116_v26 }
  0xcb   :  { %2680 = vmatprep.subr.mxu1 %v3146_v38  ;;  %1511 = vmatprep.subr.mxu0 %v1499_v6 }
  0xcc   :  { %2520 = vmatmul.mubr.msk.f32.gmra.mrb[4].mxu0 %vm48_vm1, %v3193_v56  ;;  %v1492_v7 = vpop.permute.xlu0 %1491  ;;  %v1484_v8 = vpop.permute.xlu1 %1483 }
  0xcd   :  { %2670 = vmatmul.mubr.msk.f32.gmra.mrb[8].mxu1 %vm48_vm1, %v3119_v27  ;;  %1165 = vmatprep.mubr.f32.mxu0 %v2947_v2  ;;  %v1498_v10 = vsel %vm1497_vm7, %v1492_v7, %v1494_v4 }
  0xce   :  { %2674 = vmatprep.mubr.msk.f32.mxu1 %vm48_vm1, %v3130_v32 }
  0xd0   :  { %2521 = vmatmul.mubr.msk.f32.gmra.mrb[6].mxu0 %vm48_vm1, %v3201_v57  ;;  %v1486_v9 = vpop.permute.xlu0 %1485  ;;  %v1488_v11 = vpop.permute.xlu1 %1487 }
  0xd1   :  { %2675 = vmatmul.mubr.msk.f32.vlgmr.msra.gmra.mrb[6].mxu1 %vm48_vm1, %v3134_v33  ;;  %1361 = vmatprep.mubr.f32.mxu0 %v2947_v2 }
  0xd2   :  { %2681 = vmatpush3.msra.mxu1 %v3146_v38  ;;  %2677 = vmatprep.mubr.msk.f32.mxu1 %vm48_vm1, %v3137_v35  ;;  %v1968_v35 = vsub.s32 1, %v1963_v30  ;;  %v2550_v38 = vld [vmem:[%s3506_s1 + $0x60] ss:$8 sm:$0x7] }
  0xd3   :  { %2688 = vmatprep.subr.mxu1 %v3167_v47  ;;  %v1965_v52 = vrot.slane %v2550_v38, %v1964_v39  ;;  %v1990_v39 = vld [vmem:[%s3507_s2 + $0x8] sm:$0xff] }
  0xd4   :  { %2526 = vmatmul.mubr.msk.f32.vlgmr.msra.gmra.mrb[0].mxu0 %vm48_vm1, %v3219_v62  ;;  %v1490_v12 = vpop.permute.xlu0 %1489  ;;  %v1708_v13 = vpop.permute.xlu1 %1707 }
  0xd5   :  { %1512 = vmatpush1.msra.mxu0 %v1498_v10  ;;  %2678 = vmatmul.mubr.msk.f32.gmra.mrb[8].mxu1 %vm48_vm1, %v3141_v36 }
  0xd6   :  { %2682 = vmatprep.mubr.msk.f32.mxu1 %vm48_vm1, %v3152_v41  ;;  %1367 = vmatprep.mubr.f32.mxu0 %v2947_v2 }
  0xd8   :  { %2527 = vmatmul.mubr.msk.f32.gmra.mrb[2].mxu0 %vm48_vm1, %v3221_v63  ;;  %v1710_v14 = vpop.permute.xlu0 %1709  ;;  %v1706_v16 = vpop.permute.xlu1 %1705 }
  0xd9   :  { %2683 = vmatmul.mubr.msk.f32.vlgmr.msra.gmra.mrb[6].mxu1 %vm48_vm1, %v3155_v42  ;;  %1373 = vmatprep.mubr.f32.mxu0 %v2947_v2  ;;  %v1713_v15 = vsel %vm1711_vm8, %v1708_v13, %v1710_v14  ;;  %v1712_v17 = vsel %vm1711_vm8, %v1706_v16, %v1708_v13 }
  0xda   :  { %2689 = vmatpush3.msra.mxu1 %v3167_v47  ;;  %2685 = vmatprep.mubr.msk.f32.mxu1 %vm48_vm1, %v3159_v43  ;;  %v1969_v47 = vrot.slane %v2550_v38, %v1968_v35 }
  0xdb   :  { %2696 = vmatprep.subr.mxu1 %v3210_v59  ;;  %1725 = vmatprep.subr.mxu0 %v1713_v15 }
  0xdc   :  { %2528 = vmatmul.mubr.msk.f32.gmra.mrb[4].mxu0 %vm48_vm1, %v3232_v1  ;;  %v1698_v18 = vpop.permute.xlu0 %1697  ;;  %v1700_v19 = vpop.permute.xlu1 %1699 }
  0xdd   :  { %2686 = vmatmul.mubr.msk.f32.gmra.mrb[8].mxu1 %vm48_vm1, %v3162_v45  ;;  %1379 = vmatprep.mubr.f32.mxu0 %v2947_v2 }
  0xde   :  { %2690 = vmatprep.mubr.msk.f32.mxu1 %vm48_vm1, %v3180_v51 }
  0xe0   :  { %2529 = vmatmul.mubr.msk.f32.gmra.mrb[6].mxu0 %vm48_vm1, %v3234_v3  ;;  %v1702_v20 = vpop.permute.xlu0 %1701  ;;  %v1704_v21 = vpop.permute.xlu1 %1703 }
  0xe1   :  { %2691 = vmatmul.mubr.msk.f32.vlgmr.msra.gmra.mrb[6].mxu1 %vm48_vm1, %v3185_v53  ;;  %1575 = vmatprep.mubr.f32.mxu0 %v2947_v2 }
  0xe2   :  { %2697 = vmatpush3.msra.mxu1 %v3210_v59  ;;  %2693 = vmatprep.mubr.msk.f32.mxu1 %vm48_vm1, %v3193_v56 }
  0xe3   :  { %2704 = vmatprep.subr.mxu1 %v1496_v5 }
  0xe4   :  { %2534 = vmatmul.mubr.msk.f32.vlgmr.msra.gmra.mrb[0].mxu0 %vm48_vm1, %v1484_v8 }
  0xe5   :  { %1726 = vmatpush1.msra.mxu0 %v1712_v17  ;;  %2694 = vmatmul.mubr.msk.f32.gmra.mrb[8].mxu1 %vm48_vm1, %v3201_v57  ;;  %v1972_v57 = vsub.s32 2, %v1963_v30 }
  0xe6   :  { %2698 = vmatprep.mubr.msk.f32.mxu1 %vm48_vm1, %v3219_v62  ;;  %1581 = vmatprep.mubr.f32.mxu0 %v2947_v2 }
  0xe7   :  { %v1973_v10 = vrot.slane %v2550_v38, %v1972_v57 }
  0xe8   :  { %2535 = vmatmul.mubr.msk.f32.gmra.mrb[2].mxu0 %vm48_vm1, %v1486_v9 }
  0xe9   :  { %2699 = vmatmul.mubr.msk.f32.vlgmr.msra.gmra.mrb[6].mxu1 %vm48_vm1, %v3221_v63  ;;  %1587 = vmatprep.mubr.f32.mxu0 %v2947_v2 }
  0xea   :  { %2705 = vmatpush3.msra.mxu1 %v1496_v5  ;;  %2701 = vmatprep.mubr.msk.f32.mxu1 %vm48_vm1, %v3232_v1 }
  0xeb   :  { %2712 = vmatprep.subr.mxu1 %v1710_v14 }
  0xec   :  { %2536 = vmatmul.mubr.msk.f32.gmra.mrb[4].mxu0 %vm48_vm1, %v1488_v11 }
  0xed   :  { %2702 = vmatmul.mubr.msk.f32.gmra.mrb[8].mxu1 %vm48_vm1, %v3234_v3  ;;  %1593 = vmatprep.mubr.f32.mxu0 %v2947_v2 }
  0xee   :  { %2706 = vmatprep.mubr.msk.f32.mxu1 %vm48_vm1, %v1484_v8 }
  0xf0   :  { %2537 = vmatmul.mubr.msk.f32.gmra.mrb[6].mxu0 %vm48_vm1, %v1490_v12 }
  0xf1   :  { %2707 = vmatmul.mubr.msk.f32.vlgmr.msra.gmra.mrb[6].mxu1 %vm48_vm1, %v1486_v9  ;;  %1789 = vmatprep.mubr.f32.mxu0 %v2947_v2  ;;  %v1918_v31 = vpop.permute.xlu0 %1917  ;;  %v1923_v33 = vpop.permute.xlu1 %1922 }
  0xf2   :  { %2713 = vmatpush3.msra.mxu1 %v1710_v14  ;;  %2709 = vmatprep.mubr.msk.f32.mxu1 %vm48_vm1, %v1488_v11 }
  0xf4   :  { %2542 = vmatmul.mubr.msk.f32.vlgmr.msra.gmra.mrb[0].mxu0 %vm48_vm1, %v1698_v18 }
  0xf5   :  { %2710 = vmatmul.mubr.msk.f32.gmra.mrb[8].mxu1 %vm48_vm1, %v1490_v12  ;;  %1795 = vmatprep.mubr.f32.mxu0 %v2947_v2  ;;  %v1928_v50 = vpop.permute.xlu1 %1927  ;;  %v1933_v6 = vpop.permute.xlu0 %1932 }
  0xf6   :  { %2714 = vmatprep.mubr.msk.f32.mxu1 %vm48_vm1, %v1698_v18 }
  0xf8   :  { %2543 = vmatmul.mubr.msk.f32.gmra.mrb[2].mxu0 %vm48_vm1, %v1700_v19 }
  0xf9   :  { %2715 = vmatmul.mubr.msk.f32.vlgmr.msra.gmra.mrb[6].mxu1 %vm48_vm1, %v1700_v19  ;;  %1801 = vmatprep.mubr.f32.mxu0 %v2947_v2 }
  0xfa   :  { %2717 = vmatprep.mubr.msk.f32.mxu1 %vm48_vm1, %v1702_v20 }
  0xfc   :  { %2544 = vmatmul.mubr.msk.f32.gmra.mrb[4].mxu0 %vm48_vm1, %v1702_v20 }
  0xfd   :  { %2718 = vmatmul.mubr.msk.f32.gmra.mrb[8].mxu1 %vm48_vm1, %v1704_v21  ;;  %1807 = vmatprep.mubr.f32.mxu0 %v2947_v2 }
  0xfe   :  { %2070 = vmatprep.mubr.f32.mxu1 %v2947_v2 }
 0x100   :  { %2545 = vmatmul.mubr.msk.f32.gmra.mrb[6].mxu0 %vm48_vm1, %v1704_v21 }
 0x17c   :  { %v129_v22 = vpop.f32.mrb[0].mxu1 }
 0x17d   :  { %v131_v23 = vpop.f32.mrb[1].mxu1 }
 0x184   :  { %v135_v24 = vpop.f32.mrb[2].mxu1 }
 0x185   :  { %v137_v25 = vpop.f32.mrb[3].mxu1 }
 0x188   :  { %v141_v26 = vpop.f32.mrb[4].mxu1 }
 0x189   :  { %v143_v27 = vpop.f32.mrb[5].mxu1 }
 0x1c7   :  { %v1791_v29 = vpop.f32.mrb[0].mxu0 }
 0x1c8   :  { %v1793_v32 = vpop.f32.mrb[1].mxu0  ;;  %v1935_v37 = vadd.f32 %v1918_v31, %v1791_v29 }
 0x1c9   :  { %v1936_v34 = vadd.f32 %v1918_v31, %v1793_v32 }
 0x1ca   :  { %v1947_v51 = vmax.f32 %v1935_v37, 0.0  ;;  %v1989_v37 = vld [vmem:[%s3507_s2] sm:$0xff] }
 0x1cb   :  { %v1797_v36 = vpop.f32.mrb[2].mxu0  ;;  %v1948_v46 = vmax.f32 %v1936_v34, 0.0 }
 0x1cc   :  { %v2831_v40 = vadd.f32 %v1797_v36, %v129_v22  ;;  %v1799_v41 = vpop.f32.mrb[3].mxu0  ;;  %v2716_v42 = vpop.f32.mrb[6].mxu1  ;;  %v3344_v5 = vmul.f32 %v1965_v52, %v1947_v51 }
 0x1cd   :  { %v2832_v43 = vadd.f32 %v1799_v41, %v131_v23  ;;  %v1880_v44 = vpop.f32.mrb[7].mxu1  ;;  %v1940_v61 = vadd.f32 %v2716_v42, %v1923_v33  ;;  %v3340_v0 = vmul.f32 %v1969_v47, %v1948_v46  ;;  %v1992_v41 = vld [vmem:[%s3507_s2 + $0x18] sm:$0xff] }
 0x1ce   :  { %v1938_v45 = vadd.f32 %v2831_v40, %v1923_v33  ;;  %v1937_v63 = vadd.f32 %v1918_v31, %v1880_v44  ;;  %v1991_v40 = vld [vmem:[%s3507_s2 + $0x10] sm:$0xff] }
 0x1cf   :  { %v1939_v48 = vadd.f32 %v2832_v43, %v1923_v33  ;;  %v1803_v49 = vpop.f32.mrb[4].mxu0  ;;  %v1952_v13 = vmax.f32 %v1940_v61, 0.0 }
 0x1d0   :  { %v1950_v53 = vmax.f32 %v1938_v45, 0.0  ;;  %v2833_v54 = vadd.f32 %v1803_v49, %v135_v24  ;;  %v1805_v55 = vpop.f32.mrb[5].mxu0  ;;  %v2719_v56 = vpop.f32.mrb[8].mxu1  ;;  %v1949_v14 = vmax.f32 %v1937_v63, 0.0 }
 0x1d1   :  { %v1951_v58 = vmax.f32 %v1939_v48, 0.0  ;;  %v2834_v59 = vadd.f32 %v1805_v55, %v137_v25  ;;  %v1890_v60 = vpop.f32.mrb[9].mxu1  ;;  %v1946_v17 = vadd.f32 %v2719_v56, %v1933_v6  ;;  %v3350_v24 = vmul.f32 %v1973_v10, %v1952_v13 }
 0x1d2   :  { %v3338_v62 = vmul.f32 %v1965_v52, %v1950_v53  ;;  %v1941_v7 = vadd.f32 %v2833_v54, %v1928_v50  ;;  %v1943_v18 = vadd.f32 %v1928_v50, %v1890_v60  ;;  %v3352_v25 = vmul.f32 %v1973_v10, %v1949_v14 }
 0x1d3   :  { %v3342_v1 = vmul.f32 %v1969_v47, %v1951_v58  ;;  %v1942_v3 = vadd.f32 %v2834_v59, %v1928_v50  ;;  %v1809_v4 = vpop.f32.mrb[6].mxu0 }
 0x1d4   :  { %v2835_v8 = vadd.f32 %v1809_v4, %v141_v26  ;;  %v1811_v9 = vpop.f32.mrb[7].mxu0  ;;  %v2783_v16 = vpack.c.bf16 %v3338_v62, %v3344_v5  ;;  %v1953_v21 = vmax.f32 %v1941_v7, 0.0  ;;  %v1955_v28 = vmax.f32 %v1943_v18, 0.0 }
 0x1d5   :  { %v2836_v11 = vadd.f32 %v1811_v9, %v143_v27  ;;  %v2781_v12 = vpack.c.bf16 %v3342_v1, %v3340_v0  ;;  %v1954_v19 = vmax.f32 %v1942_v3, 0.0  ;;  %v1958_v27 = vmax.f32 %v1946_v17, 0.0 }
 0x1d6   :  { %v1944_v15 = vadd.f32 %v2835_v8, %v1933_v6  ;;  %v3360_v31 = vmul.f32 %v1965_v52, %v1953_v21  ;;  %v3368_v35 = vmul.f32 %v1973_v10, %v1955_v28  ;;  %v2789_v36 = vpack.c.bf16 %v3350_v24, %v3352_v25 }
 0x1d7   :  { %v1945_v20 = vadd.f32 %v2836_v11, %v1933_v6  ;;  %2782 = vmatprep.subr.bf16.mxu1 %v2781_v12  ;;  %v3356_v29 = vmul.f32 %v1969_v47, %v1954_v19  ;;  %v3366_v34 = vmul.f32 %v1973_v10, %v1958_v27  ;;  %v2217_v18 = vadd.f32 %v3342_v1, %v3338_v62 }
 0x1d8   :  { %v1956_v22 = vmax.f32 %v1944_v15, 0.0  ;;  %2784 = vmatpush1.bf16.msra.mxu1 %v2783_v16  ;;  %v2213_v19 = vsel %vm1993_vm9, %v3352_v25, 0.0  ;;  %v2218_v21 = vsel %vm1993_vm9, %v3350_v24, 0.0 }
 0x1d9   :  { %v1957_v23 = vmax.f32 %v1945_v20, 0.0  ;;  %v2793_v38 = vpack.c.bf16 %v3366_v34, %v3368_v35  ;;  %v2212_v20 = vadd.f32 %v3340_v0, %v3344_v5  ;;  %v2222_v28 = vadd.f32 %v3356_v29, %v3360_v31 }
 0x1da   :  { %v3354_v26 = vmul.f32 %v1965_v52, %v1956_v22  ;;  %v2219_v22 = vadd.f32 %v2218_v21, %v2217_v18 }
 0x1db   :  { %v3358_v30 = vmul.f32 %v1969_v47, %v1957_v23  ;;  %v2214_v23 = vadd.f32 %v2213_v19, %v2212_v20 }
 0x1dc   :  { %v2787_v33 = vpack.c.bf16 %v3354_v26, %v3360_v31 }
 0x1dd   :  { %v2785_v32 = vpack.c.bf16 %v3358_v30, %v3356_v29  ;;  %v2227_v27 = vadd.f32 %v3358_v30, %v3354_v26 }
 0x1df   :  { %2786 = vmatprep.subr.bf16.mxu1 %v2785_v32 }
 0x1e0   :  { %2788 = vmatpush1.bf16.msra.mxu1 %v2787_v33 }
 0x1e1   :  { %2790 = vmatprep.subr.bf16.mxu1 %v2789_v36 }
 0x1e3   :  { %2551 = vmatmul.mubr.msk.f32.vlgmr.msra.gmra.mrb[10].mxu1 %vm1993_vm9, %v1989_v37 }
 0x1e4   :  { %2792 = vmatpush3.bf16.msra.mxu1 %v2789_v36  ;;  %2076 = vmatprep.mubr.f32.mxu1 %v2947_v2 }
 0x1e5   :  { %2794 = vmatprep.subr.bf16.mxu1 %v2793_v38 }
 0x1e7   :  { %2552 = vmatmul.mubr.msk.f32.gmra.mrb[12].mxu1 %vm1993_vm9, %v1990_v39 }
 0x1e8   :  { %2796 = vmatpush3.bf16.msra.mxu1 %v2793_v38  ;;  %2082 = vmatprep.mubr.f32.mxu1 %v2947_v2 }
 0x1eb   :  { %2553 = vmatmul.mubr.msk.f32.gmra.mrb[14].mxu1 %vm1993_vm9, %v1991_v40 }
 0x1ec   :  { %2088 = vmatprep.mubr.f32.mxu1 %v2947_v2 }
 0x1ef   :  { %2554 = vmatmul.mubr.msk.f32.gmra.mrb[16].mxu1 %vm1993_vm9, %v1992_v41 }
 0x1f0   :  { %2728 = vmatprep.mubr.msk.f32.mxu1 %vm1993_vm9, %v1989_v37 }
 0x1f3   :  { %2729 = vmatmul.mubr.msk.f32.vlgmr.msra.gmra.mrb[18].mxu1 %vm1993_vm9, %v1990_v39  ;;  %v2233_v39 = vld [vmem:[%s3507_s2 + $0x28] sm:$0xff] }
 0x1f4   :  { %2731 = vmatprep.mubr.msk.f32.mxu1 %vm1993_vm9, %v1991_v40  ;;  %v2234_v40 = vld [vmem:[%s3507_s2 + $0x30] sm:$0xff] }
 0x1f7   :  { %2732 = vmatmul.mubr.msk.f32.gmra.mrb[20].mxu1 %vm1993_vm9, %v1992_v41  ;;  %v2235_v41 = vld [vmem:[%s3507_s2 + $0x38] sm:$0xff] }
 0x2b6   :  { %v2072_v42 = vpop.f32.mrb[10].mxu1 }
 0x2b7   :  { %v2180_v43 = vmul.f32 %v2072_v42, %v3344_v5  ;;  %v2074_v44 = vpop.f32.mrb[11].mxu1  ;;  %v2236_v42 = vld [vmem:[%s3507_s2 + $0x40] sm:$0xff] }
 0x2b8   :  { %v2181_v2 = vmul.f32 %v2074_v44, %v3340_v0  ;;  %v2238_v44 = vld [vmem:[%s3507_s2 + $0x50] sm:$0xff] }
 0x2ba   :  { %v2192_v45 = vadd.f32 %v2181_v2, %v2180_v43  ;;  %v2078_v46 = vpop.f32.mrb[12].mxu1  ;;  %v2237_v43 = vld [vmem:[%s3507_s2 + $0x48] sm:$0xff]  ;;  %v2239_v2 = vld [vmem:[%s3507_s2 + $0x58] sm:$0xff] }
 0x2bb   :  { %v2183_v47 = vmul.f32 %v2078_v46, %v3338_v62  ;;  %v2080_v48 = vpop.f32.mrb[13].mxu1  ;;  %v2228_v62 = vsel %vm1993_vm9, %v3366_v34, 0.0  ;;  %v2241_v46 = vld [vmem:[%s3507_s2 + $0x98] sm:$0xff] }
 0x2bc   :  { %v2184_v49 = vmul.f32 %v2080_v48, %v3342_v1  ;;  %v2223_v1 = vsel %vm1993_vm9, %v3368_v35, 0.0  ;;  %v2229_v0 = vadd.f32 %v2228_v62, %v2227_v27  ;;  %v2389_v27 = vld [vmem:[%s3507_s2 + $0xd8] sm:$0xff] }
 0x2bd   :  { %v2224_v5 = vadd.f32 %v2223_v1, %v2222_v28  ;;  %v2388_v28 = vld [vmem:[%s3507_s2 + $0xd0] sm:$0xff] }
 0x2be   :  { %v2197_v50 = vadd.f32 %v2184_v49, %v2183_v47  ;;  %v2084_v51 = vpop.f32.mrb[14].mxu1  ;;  %v2240_v47 = vld [vmem:[%s3507_s2 + $0x90] sm:$0xff] }
 0x2bf   :  { %v2186_v52 = vmul.f32 %v2084_v51, %v3360_v31  ;;  %v2086_v53 = vpop.f32.mrb[15].mxu1 }
 0x2c0   :  { %v2187_v54 = vmul.f32 %v2086_v53, %v3356_v29 }
 0x2c2   :  { %v2202_v55 = vadd.f32 %v2187_v54, %v2186_v52  ;;  %v2090_v56 = vpop.f32.mrb[16].mxu1  ;;  %v2243_v52 = vld [vmem:[%s3507_s2 + $0xa8] sm:$0xff]  ;;  %v2242_v54 = vld [vmem:[%s3507_s2 + $0xa0] sm:$0xff] }
 0x2c3   :  { %v2189_v57 = vmul.f32 %v2090_v56, %v3354_v26  ;;  %v2092_v58 = vpop.f32.mrb[17].mxu1 }
 0x2c4   :  { %v2190_v59 = vmul.f32 %v2092_v58, %v3358_v30 }
 0x2c6   :  { %v2207_v60 = vadd.f32 %v2190_v59, %v2189_v57  ;;  %v2730_v61 = vpop.f32.mrb[18].mxu1 }
 0x2c7   :  { %v2185_v63 = vmul.f32 %v2730_v61, %v3350_v24  ;;  %v2161_v3 = vpop.f32.mrb[19].mxu1  ;;  %v2232_v24 = vld [vmem:[%s3507_s2 + $0x20] sm:$0xff]  ;;  %v2245_v61 = vld [vmem:[%s3507_s2 + $0xb8] sm:$0xff] }
 0x2c8   :  { %v2182_v4 = vmul.f32 %v2161_v3, %v3352_v25  ;;  %2750 = vmatprep.mubr.msk.f32.mxu1 %vm2248_vm10, %v2232_v24  ;;  %v2244_v3 = vld [vmem:[%s3507_s2 + $0xb0] sm:$0xff] }
 0x2c9   :  { %v2198_v6 = vsel %vm1993_vm9, %v2185_v63, 0.0 }
 0x2ca   :  { %v2733_v7 = vpop.f32.mrb[20].mxu1  ;;  %v2199_v8 = vadd.f32 %v2198_v6, %v2197_v50  ;;  %v2193_v9 = vsel %vm1993_vm9, %v2182_v4, 0.0 }
 0x2cb   :  { %v2191_v10 = vmul.f32 %v2733_v7, %v3366_v34  ;;  %v2171_v11 = vpop.f32.mrb[21].mxu1  ;;  %v2194_v12 = vadd.f32 %v2193_v9, %v2192_v45  ;;  %v2386_v45 = vld [vmem:[%s3507_s2 + $0x60] sm:$0xff] }
 0x2cc   :  { %v2188_v13 = vmul.f32 %v2171_v11, %v3368_v35  ;;  %2200 = vadd.xlane.f32.xlu0 %v2199_v8  ;;  %v2247_v11 = vld [vmem:[%s3507_s2 + $0xc8] sm:$0xff] }
 0x2cd   :  { %2195 = vadd.xlane.f32.xlu1 %v2194_v12  ;;  %v2208_v14 = vsel %vm1993_vm9, %v2191_v10, 0.0 }
 0x2ce   :  { %v2209_v15 = vadd.f32 %v2208_v14, %v2207_v60  ;;  %v2203_v16 = vsel %vm1993_vm9, %v2188_v13, 0.0  ;;  %v2246_v13 = vld [vmem:[%s3507_s2 + $0xc0] sm:$0xff] }
 0x2cf   :  { %v2204_v17 = vadd.f32 %v2203_v16, %v2202_v55 }
 0x2d1   :  { %2210 = vadd.xlane.f32.xlu1 %v2209_v15  ;;  %2205 = vadd.xlane.f32.xlu0 %v2204_v17 }
 0x2d5   :  { %2220 = vadd.xlane.f32.xlu1 %v2219_v22  ;;  %2215 = vadd.xlane.f32.xlu0 %v2214_v23  ;;  %v2387_v23 = vld [vmem:[%s3507_s2 + $0x68] sm:$0xff] }
 0x2d9   :  { %2230 = vadd.xlane.f32.xlu1 %v2229_v0  ;;  %2225 = vadd.xlane.f32.xlu0 %v2224_v5 }
 0x359   :  { %v2201_v25 = vpop.xlane.xlu0 %2200 }
 0x35a   :  { %v2196_v26 = vpop.xlane.xlu1 %2195 }
 0x35b   :  { %v2797_v29 = vpack.c.bf16 %v2201_v25, %v2196_v26 }
 0x35d   :  { %2798 = vmatprep.subr.bf16.mxu1 %v2797_v29 }
 0x35e   :  { %2800 = vmatpush3.bf16.msra.mxu1 %v2797_v29  ;;  %v2211_v30 = vpop.xlane.xlu1 %2210  ;;  %v2206_v31 = vpop.xlane.xlu0 %2205 }
 0x35f   :  { %v2801_v32 = vpack.c.bf16 %v2211_v30, %v2206_v31 }
 0x361   :  { %2802 = vmatprep.subr.bf16.mxu1 %v2801_v32 }
 0x362   :  { %v2221_v33 = vpop.xlane.xlu1 %2220  ;;  %2804 = vmatpush3.bf16.msra.mxu1 %v2801_v32  ;;  %v2216_v34 = vpop.xlane.xlu0 %2215 }
 0x363   :  { %v2805_v35 = vpack.c.bf16 %v2221_v33, %v2216_v34 }
 0x365   :  { %2806 = vmatprep.subr.bf16.mxu1 %v2805_v35 }
 0x366   :  { %v2231_v36 = vpop.xlane.xlu1 %2230  ;;  %2808 = vmatpush3.bf16.msra.mxu1 %v2805_v35  ;;  %v2226_v37 = vpop.xlane.xlu0 %2225 }
 0x367   :  { %v2809_v38 = vpack.c.bf16 %v2231_v36, %v2226_v37 }
 0x369   :  { %2810 = vmatprep.subr.bf16.mxu1 %v2809_v38 }
 0x36a   :  { %2812 = vmatpush3.bf16.msra.mxu1 %v2809_v38 }
 0x36d   :  { %2751 = vmatmul.mubr.msk.f32.vlgmr.msra.gmra.mrb[22].mxu1 %vm2248_vm10, %v2233_v39 }
 0x36e   :  { %2753 = vmatprep.mubr.msk.f32.mxu1 %vm2248_vm10, %v2234_v40 }
 0x371   :  { %2754 = vmatmul.mubr.msk.f32.gmra.mrb[24].mxu1 %vm2248_vm10, %v2235_v41 }
 0x372   :  { %2756 = vmatprep.mubr.msk.f32.mxu1 %vm2248_vm10, %v2236_v42 }
 0x375   :  { %2757 = vmatmul.mubr.msk.f32.gmra.mrb[26].mxu1 %vm2248_vm10, %v2237_v43 }
 0x376   :  { %2759 = vmatprep.mubr.msk.f32.mxu1 %vm2248_vm10, %v2238_v44 }
 0x379   :  { %2760 = vmatmul.mubr.msk.f32.gmra.mrb[28].mxu1 %vm2248_vm10, %v2239_v2 }
 0x37a   :  { %2778 = vmatprep.mubr.msk.f32.mxu1 %vm2248_vm10, %v2386_v45 }
 0x440   :  { %v2752_v48 = vpop.f32.mrb[22].mxu1 }
 0x441   :  { %v2345_v49 = vadd.f32 %v2752_v48, %v2241_v46  ;;  %v2339_v50 = vpop.f32.mrb[23].mxu1 }
 0x442   :  { %v2340_v51 = vadd.f32 %v2339_v50, %v2240_v47 }
 0x443   :  { %v2379_v53 = vmax.f32 %v2345_v49, 0.0 }
 0x444   :  { %v2378_v55 = vmax.f32 %v2340_v51, 0.0  ;;  %v2755_v56 = vpop.f32.mrb[24].mxu1 }
 0x445   :  { %v2355_v57 = vadd.f32 %v2755_v56, %v2243_v52  ;;  %v2349_v58 = vpop.f32.mrb[25].mxu1 }
 0x446   :  { %v2813_v59 = vpack.c.bf16 %v2379_v53, %v2378_v55  ;;  %v2350_v60 = vadd.f32 %v2349_v58, %v2242_v54 }
 0x447   :  { %v2381_v63 = vmax.f32 %v2355_v57, 0.0 }
 0x448   :  { %v2380_v4 = vmax.f32 %v2350_v60, 0.0  ;;  %v2758_v6 = vpop.f32.mrb[26].mxu1  ;;  %2814 = vmatprep.subr.bf16.mxu1 %v2813_v59 }
 0x449   :  { %v2365_v7 = vadd.f32 %v2758_v6, %v2245_v61  ;;  %v2359_v8 = vpop.f32.mrb[27].mxu1  ;;  %2816 = vmatpush3.bf16.msra.mxu1 %v2813_v59 }
 0x44a   :  { %v2817_v9 = vpack.c.bf16 %v2381_v63, %v2380_v4  ;;  %v2360_v10 = vadd.f32 %v2359_v8, %v2244_v3 }
 0x44b   :  { %v2383_v12 = vmax.f32 %v2365_v7, 0.0 }
 0x44c   :  { %v2382_v14 = vmax.f32 %v2360_v10, 0.0  ;;  %v2761_v15 = vpop.f32.mrb[28].mxu1  ;;  %2818 = vmatprep.subr.bf16.mxu1 %v2817_v9 }
 0x44d   :  { %v2375_v16 = vadd.f32 %v2761_v15, %v2247_v11  ;;  %v2369_v17 = vpop.f32.mrb[29].mxu1  ;;  %2820 = vmatpush3.bf16.msra.mxu1 %v2817_v9 }
 0x44e   :  { %v2821_v18 = vpack.c.bf16 %v2383_v12, %v2382_v14  ;;  %v2370_v19 = vadd.f32 %v2369_v17, %v2246_v13 }
 0x44f   :  { %v2385_v20 = vmax.f32 %v2375_v16, 0.0 }
 0x450   :  { %v2384_v21 = vmax.f32 %v2370_v19, 0.0  ;;  %2822 = vmatprep.subr.bf16.mxu1 %v2821_v18 }
 0x451   :  { %2824 = vmatpush3.bf16.msra.mxu1 %v2821_v18 }
 0x452   :  { %v2825_v22 = vpack.c.bf16 %v2385_v20, %v2384_v21 }
 0x454   :  { %2826 = vmatprep.subr.bf16.mxu1 %v2825_v22 }
 0x455   :  { %2828 = vmatpush3.bf16.msra.mxu1 %v2825_v22 }
 0x458   :  { %2779 = vmatmul.mubr.msk.f32.vlgmr.msra.gmra.mrb[30].mxu1 %vm2248_vm10, %v2387_v23 }
 0x52b   :  { %v2780_v62 = vpop.f32.mrb[30].mxu1 }
 0x52c   :  { %v2468_v1 = vadd.f32 %v2780_v62, %v2389_v27  ;;  %v2462_v0 = vpop.f32.mrb[31].mxu1 }
 0x52d   :  { %v2463_v5 = vadd.f32 %v2462_v0, %v2388_v28 }
 0x52e   :  { %2473 = vst.msk [vmem:[%s3508_s3 + $0x8] sm:$0xff] %vm2471_vm11, %v2468_v1 }
 0x52f   :  { %2472 = vst.msk [vmem:[%s3508_s3] sm:$0xff] %vm2471_vm11, %v2463_v5 }

</bundles_post_ra>
